<compile_context>
chip_gen: v6e
topology: v6e:2x2x1
jax: 0.10.0
libtpu: 0.0.40
codegen_flags: <defaults>
</compile_context>

<pallas_src>
import math

import jax
import jax.numpy as jnp
from jax.experimental import pallas as pl
from jax.experimental.pallas import tpu as pltpu


def _round_up(v, m):
    return ((v + m - 1) // m) * m


def _pick_tile_n(dim, max_tile):
    """N tiles may be partial (masked stores), so any 128-multiple tile is fine."""
    if dim <= max_tile:
        return dim
    return max(128, (max_tile // 128) * 128)


def _pick_tile_k(dim, max_tile):
    """K tiles must divide in_dim exactly (a partial K block would pollute valid rows)."""
    if dim <= max_tile:
        return dim
    if dim % 128 == 0:
        cand = (max_tile // 128) * 128
        while cand >= 128 and dim % cand:
            cand -= 128
        return max(cand, 128)
    # TODO(synk): in_dim > max_tile and not a multiple of 128 forces a full-K slab
    # (lane constraints disallow any other block width for x's last dim).
    return dim


def _lora_kernel(x_ref, w_ref, bias_ref, s_ref, b_ref, o_ref, acc_ref):
    ki = pl.program_id(2)

    @pl.when(ki == 0)
    def _init():
        # Fold the bias into the accumulator init (saves a (tm, tn) VPU add at finalize).
        acc_ref[...] = jnp.broadcast_to(bias_ref[...], acc_ref.shape)

    # Base partial: x @ W_tile on the MXU, f32 accumulation.
    acc_ref[...] += jnp.dot(x_ref[...], w_ref[...],
                            preferred_element_type=jnp.float32)

    @pl.when(ki == pl.num_programs(2) - 1)
    def _finalize():
        # s_ref already holds (x @ A^T) * clamp(alpha, 1e-7, 100) / sqrt(rank), in f32.
        lora = jnp.dot(s_ref[...], b_ref[...], preferred_element_type=jnp.float32)
        o_ref[...] = (acc_ref[...] + lora).astype(o_ref.dtype)


def rank_one_lora_forward(x, w, bias, a_vectors, b_vectors, alpha, *,
                          tile_m=512, max_tile_n=512, max_tile_k=1024,
                          compute_dtype=jnp.bfloat16):
    """x: (B, T, in_dim). Returns (B, T, out_dim)."""
    B, T, in_dim = x.shape
    in_dim_w, out_dim = w.shape
    assert in_dim == in_dim_w
    rank = a_vectors.shape[0]
    scale = 1.0 / math.sqrt(rank)
    out_dtype = x.dtype
    cdt = jnp.dtype(compute_dtype)

    BT = B * T
    bt_eff = _round_up(BT, 8)                    # tiny sublane pad only (<= 7 rows)
    tm = min(_round_up(int(tile_m), 8), bt_eff)
    tn = _pick_tile_n(out_dim, max_tile_n)
    tk = _pick_tile_k(in_dim, max_tile_k)

    x_2d = x.reshape(BT, in_dim)
    if bt_eff != BT:
        x_2d = jnp.pad(x_2d, ((0, bt_eff - BT), (0, 0)))

    # LoRA projection is rank-wide (tiny): compute it once here in f32 instead of pushing
    # a (tm, tk) x (tk, rank) MXU pass through the kernel for every N tile.
    x_f32 = x_2d.astype(jnp.float32)
    a_t = jnp.transpose(a_vectors).astype(jnp.float32)            # (in_dim, rank)
    alpha_eff = (jnp.clip(alpha.astype(jnp.float32), 1e-7, 100.0) * scale).reshape(1, rank)
    s_gated = (x_f32 @ a_t) * alpha_eff                           # (bt_eff, rank), f32

    x_c = x_2d.astype(cdt)
    w_c = w.astype(cdt)
    bias_2d = bias.reshape(1, out_dim).astype(jnp.float32)
    b_f32 = b_vectors.astype(jnp.float32)                         # tiny; keep LoRA path f32

    # M and N use cdiv (partial last blocks are row/column-independent and masked on
    # store); K must divide exactly.
    grid = (pl.cdiv(bt_eff, tm), pl.cdiv(out_dim, tn), in_dim // tk)

    def _isz(dt):
        return int(jnp.dtype(dt).itemsize)

    # Rough per-call VMEM footprint: double-buffered inputs/output + f32 accumulator.
    est_vmem = (2 * (tm * tk * _isz(cdt) + tk * tn * _isz(cdt)
                     + tn * 4 + tm * rank * 4 + rank * tn * 4
                     + tm * tn * _isz(out_dtype))
                + tm * tn * 4)
    # >= 32 MiB so larger tiles work beyond v5e's 16 MiB scoped default; <= 48 MiB to stay
    # well inside v7x's 64 MiB physical VMEM.
    vmem_limit = int(max(32 * 1024 * 1024, min(48 * 1024 * 1024, 2 * est_vmem)))

    def _nbytes(a):
        return int(a.size) * int(a.dtype.itemsize)

    cost = pl.CostEstimate(
        flops=2 * bt_eff * in_dim * out_dim + 2 * bt_eff * rank * out_dim,
        transcendentals=0,
        bytes_accessed=(_nbytes(x_c) + _nbytes(w_c) + _nbytes(bias_2d)
                        + _nbytes(s_gated) + _nbytes(b_f32)
                        + bt_eff * out_dim * _isz(out_dtype)),
    )

    out_2d = pl.pallas_call(
        _lora_kernel,
        out_shape=jax.ShapeDtypeStruct((bt_eff, out_dim), out_dtype),
        grid_spec=pltpu.PrefetchScalarGridSpec(
            num_scalar_prefetch=0,
            grid=grid,
            in_specs=[
                pl.BlockSpec((tm, tk), lambda mi, ni, ki: (mi, ki)),     # x row tile
                pl.BlockSpec((tk, tn), lambda mi, ni, ki: (ki, ni)),     # W tile (N/K tiled)
                pl.BlockSpec((1, tn), lambda mi, ni, ki: (0, ni)),       # bias tile
                pl.BlockSpec((tm, rank), lambda mi, ni, ki: (mi, 0)),    # precomputed gated s
                pl.BlockSpec((rank, tn), lambda mi, ni, ki: (0, ni)),    # B tile
            ],
            out_specs=pl.BlockSpec((tm, tn), lambda mi, ni, ki: (mi, ni)),
            scratch_shapes=[pltpu.VMEM((tm, tn), jnp.float32)],          # base accumulator
        ),
        compiler_params=pltpu.CompilerParams(
            # N (usually >= 2 tiles) carries the cross-core split on v7x; s is a plain
            # input, so there is no ni==0 scratch dependency to break.
            dimension_semantics=("parallel", "parallel", "arbitrary"),
            vmem_limit_bytes=vmem_limit,
        ),
        cost_estimate=cost,
    )(x_c, w_c, bias_2d, s_gated, b_f32)

    if bt_eff != BT:
        out_2d = out_2d[:BT]
    return out_2d.reshape(B, T, out_dim)


def _reference(x, w, bias, a_vectors, b_vectors, alpha):
    B, T, in_dim = x.shape
    rank = a_vectors.shape[0]
    scale = 1.0 / math.sqrt(rank)
    x_2d = x.reshape(B * T, in_dim).astype(jnp.float32)
    base = x_2d @ w.astype(jnp.float32) + bias.astype(jnp.float32)[None, :]
    s = x_2d @ a_vectors.astype(jnp.float32).T
    alpha_c = jnp.clip(alpha.astype(jnp.float32), 1e-7, 100.0)
    lora = (s[:, :, None] * b_vectors.astype(jnp.float32)[None, :, :]
            * alpha_c[None, :, None] * scale).sum(1)
    return (base + lora).reshape(B, T, -1)


if __name__ == "__main__":
    key = jax.random.PRNGKey(0)
    k1, k2, k3, k4, k5, k6, k7, k8 = jax.random.split(key, 8)

    # --- Small shapes consistent with the module's forward: (B, T, in_dim) ---
    B, T, in_dim, out_dim, rank = 2, 8, 32, 32, 8
    x = jax.random.normal(k1, (B, T, in_dim), jnp.float32)
    w = jax.random.normal(k2, (in_dim, out_dim), jnp.float32) * 0.02   # frozen base weight
    bias = jnp.zeros((out_dim,), jnp.float32)                          # base bias (None -> zeros)
    a_vectors = jax.random.normal(k3, (rank, in_dim), jnp.float32) * 0.01
    b_vectors = jax.random.normal(k4, (rank, out_dim), jnp.float32) * 0.01
    alpha = jnp.ones((rank,), jnp.float32) * 0.1

    ref = _reference(x, w, bias, a_vectors, b_vectors, alpha)

    # f32 MXU-operand path: tight tolerance vs reference.
    out_f32 = jax.block_until_ready(
        rank_one_lora_forward(x, w, bias, a_vectors, b_vectors, alpha,
                              compute_dtype=jnp.float32))
    assert out_f32.shape == (B, T, out_dim)
    assert jnp.allclose(out_f32, ref, atol=1e-4, rtol=1e-4), "f32 mismatch vs reference"

    # Default path (bf16 MXU operands, f32 accumulation): looser tolerance.
    out_bf16 = jax.block_until_ready(
        rank_one_lora_forward(x, w, bias, a_vectors, b_vectors, alpha))
    assert float(jnp.max(jnp.abs(out_bf16.astype(jnp.float32) - ref))) < 5e-2, "bf16 mismatch"

    # --- Larger case: exercises the minimal-M pad, partial last M block, N/K tiling and
    #     the K-axis accumulator (BT=140 -> bt_eff=144, tm=64 -> partial third M block) ---
    B2, T2, in2, out2 = 2, 70, 256, 256
    x2 = jax.random.normal(k5, (B2, T2, in2), jnp.float32)
    w2 = jax.random.normal(k6, (in2, out2), jnp.float32) * 0.02
    bias2 = jax.random.normal(k7, (out2,), jnp.float32) * 0.01
    a2 = jax.random.normal(k8, (rank, in2), jnp.float32) * 0.01
    b2 = jax.random.normal(k1, (rank, out2), jnp.float32) * 0.01
    alpha2 = jnp.linspace(0.05, 0.2, rank, dtype=jnp.float32)

    ref2 = _reference(x2, w2, bias2, a2, b2, alpha2)

    out2_f32 = jax.block_until_ready(
        rank_one_lora_forward(x2, w2, bias2, a2, b2, alpha2,
                              tile_m=64, max_tile_n=128, max_tile_k=128,
                              compute_dtype=jnp.float32))
    assert out2_f32.shape == (B2, T2, out2)
    assert jnp.allclose(out2_f32, ref2, atol=1e-3, rtol=1e-3), "tiled f32 mismatch vs reference"

    # Default (bf16 operands, big tiles) on the larger case.
    out2_bf16 = jax.block_until_ready(
        rank_one_lora_forward(x2, w2, bias2, a2, b2, alpha2))
    assert float(jnp.max(jnp.abs(out2_bf16.astype(jnp.float32) - ref2))) < 5e-2, "bf16 mismatch"

    print("KERNEL_OK")
</pallas_src>

<mosaic_0001>
module attributes {stable_mosaic.version = 11 : i64} {
  func.func @_lora_kernel(%arg0: i32, %arg1: i32, %arg2: i32, %arg3: memref<16x32xf32, #tpu.memory_space<vmem>>, %arg4: memref<32x32xf32, #tpu.memory_space<vmem>>, %arg5: memref<1x32xf32, #tpu.memory_space<vmem>>, %arg6: memref<16x8xf32, #tpu.memory_space<vmem>>, %arg7: memref<8x32xf32, #tpu.memory_space<vmem>>, %arg8: memref<16x32xf32, #tpu.memory_space<vmem>>, %arg9: memref<16x32xf32, #tpu.memory_space<vmem>>) attributes {dimension_semantics = [#tpu.dimension_semantics<parallel>, #tpu.dimension_semantics<parallel>, #tpu.dimension_semantics<arbitrary>], iteration_bounds = array<i64: 1, 1, 1>, scalar_prefetch = 0 : i64, scratch_operands = 1 : i64, tpu.core_type = #tpu.core_type<tc>, window_params = [{transform_indices = @transform_0, window_bounds = array<i64: 16, 32>}, {transform_indices = @transform_1, window_bounds = array<i64: 32, 32>}, {transform_indices = @transform_2, window_bounds = array<i64: 1, 32>}, {transform_indices = @transform_3, window_bounds = array<i64: 16, 8>}, {transform_indices = @transform_4, window_bounds = array<i64: 8, 32>}, {transform_indices = @transform_5, window_bounds = array<i64: 16, 32>}]} {
    %c0_i32 = arith.constant 0 : i32
    %0 = arith.cmpi eq, %arg2, %c0_i32 : i32
    %1 = arith.extui %0 : i1 to i32
    %c0_i32_0 = arith.constant 0 : i32
    %2 = arith.cmpi ne, %1, %c0_i32_0 : i32
    scf.if %2 {
      %c0_10 = arith.constant 0 : index
      %c0_11 = arith.constant 0 : index
      %12 = vector.load %arg5[%c0_10, %c0_11] : memref<1x32xf32, #tpu.memory_space<vmem>>, vector<1x32xf32>
      %13 = vector.shape_cast %12 : vector<1x32xf32> to vector<1x32xf32>
      %14 = vector.broadcast %13 : vector<1x32xf32> to vector<16x32xf32>
      %c0_12 = arith.constant 0 : index
      %c0_13 = arith.constant 0 : index
      %15 = vector.load %arg9[%c0_12, %c0_13] : memref<16x32xf32, #tpu.memory_space<vmem>>, vector<16x32xf32>
      tpu.vector_store %arg9[%c0_12, %c0_13], %14 {strides = array<i32>} : memref<16x32xf32, #tpu.memory_space<vmem>>, vector<16x32xf32>,
    } else {
    }
    %c0 = arith.constant 0 : index
    %c0_1 = arith.constant 0 : index
    %3 = vector.load %arg9[%c0, %c0_1] : memref<16x32xf32, #tpu.memory_space<vmem>>, vector<16x32xf32>
    %c0_2 = arith.constant 0 : index
    %c0_3 = arith.constant 0 : index
    %4 = vector.load %arg3[%c0_2, %c0_3] : memref<16x32xf32, #tpu.memory_space<vmem>>, vector<16x32xf32>
    %c0_4 = arith.constant 0 : index
    %c0_5 = arith.constant 0 : index
    %5 = vector.load %arg4[%c0_4, %c0_5] : memref<32x32xf32, #tpu.memory_space<vmem>>, vector<32x32xf32>
    %cst = arith.constant dense<0.000000e+00> : vector<16x32xf32>
    %6 = tpu.matmul %4, %5, %cst {dimension_numbers = #tpu.dot_dimension_numbers<[1], [0], [0], [1], [0, 0, 1, 1], [], []>} : vector<16x32xf32>, vector<32x32xf32>, vector<16x32xf32> -> vector<16x32xf32>
    %7 = arith.addf %3, %6 : vector<16x32xf32>
    %c0_6 = arith.constant 0 : index
    %c0_7 = arith.constant 0 : index
    %8 = vector.load %arg9[%c0_6, %c0_7] : memref<16x32xf32, #tpu.memory_space<vmem>>, vector<16x32xf32>
    tpu.vector_store %arg9[%c0_6, %c0_7], %7 {strides = array<i32>} : memref<16x32xf32, #tpu.memory_space<vmem>>, vector<16x32xf32>,
    %c0_i32_8 = arith.constant 0 : i32
    %9 = arith.cmpi eq, %arg2, %c0_i32_8 : i32
    %10 = arith.extui %9 : i1 to i32
    %c0_i32_9 = arith.constant 0 : i32
    %11 = arith.cmpi ne, %10, %c0_i32_9 : i32
    scf.if %11 {
      %c0_10 = arith.constant 0 : index
      %c0_11 = arith.constant 0 : index
      %12 = vector.load %arg6[%c0_10, %c0_11] : memref<16x8xf32, #tpu.memory_space<vmem>>, vector<16x8xf32>
      %c0_12 = arith.constant 0 : index
      %c0_13 = arith.constant 0 : index
      %13 = vector.load %arg7[%c0_12, %c0_13] : memref<8x32xf32, #tpu.memory_space<vmem>>, vector<8x32xf32>
      %cst_14 = arith.constant dense<0.000000e+00> : vector<16x32xf32>
      %14 = tpu.matmul %12, %13, %cst_14 {dimension_numbers = #tpu.dot_dimension_numbers<[1], [0], [0], [1], [0, 0, 1, 1], [], []>} : vector<16x8xf32>, vector<8x32xf32>, vector<16x32xf32> -> vector<16x32xf32>
      %c0_15 = arith.constant 0 : index
      %c0_16 = arith.constant 0 : index
      %15 = vector.load %arg9[%c0_15, %c0_16] : memref<16x32xf32, #tpu.memory_space<vmem>>, vector<16x32xf32>
      %16 = arith.addf %15, %14 : vector<16x32xf32>
      %c0_17 = arith.constant 0 : index
      %c0_18 = arith.constant 0 : index
      %17 = vector.load %arg8[%c0_17, %c0_18] : memref<16x32xf32, #tpu.memory_space<vmem>>, vector<16x32xf32>
      tpu.vector_store %arg8[%c0_17, %c0_18], %16 {strides = array<i32>} : memref<16x32xf32, #tpu.memory_space<vmem>>, vector<16x32xf32>,
    } else {
    }
    return
  }
  func.func @transform_0(%arg0: i32, %arg1: i32, %arg2: i32) -> (i32, i32) {
    %c0_i32 = arith.constant 0 : i32
    return %arg0, %arg2 : i32, i32
  }
  func.func @transform_1(%arg0: i32, %arg1: i32, %arg2: i32) -> (i32, i32) {
    %c0_i32 = arith.constant 0 : i32
    return %arg2, %arg1 : i32, i32
  }
  func.func @transform_2(%arg0: i32, %arg1: i32, %arg2: i32) -> (i32, i32) {
    %c0_i32 = arith.constant 0 : i32
    %c0_i32_0 = arith.constant 0 : i32
    return %c0_i32, %arg1 : i32, i32
  }
  func.func @transform_3(%arg0: i32, %arg1: i32, %arg2: i32) -> (i32, i32) {
    %c0_i32 = arith.constant 0 : i32
    %c0_i32_0 = arith.constant 0 : i32
    return %arg0, %c0_i32 : i32, i32
  }
  func.func @transform_4(%arg0: i32, %arg1: i32, %arg2: i32) -> (i32, i32) {
    %c0_i32 = arith.constant 0 : i32
    %c0_i32_0 = arith.constant 0 : i32
    return %c0_i32, %arg1 : i32, i32
  }
  func.func @transform_5(%arg0: i32, %arg1: i32, %arg2: i32) -> (i32, i32) {
    %c0_i32 = arith.constant 0 : i32
    return %arg0, %arg1 : i32, i32
  }
}

</mosaic_0001>

<bundles_post_ra>
// kernel: tpu_custom_call.1
= control target key start
LH: loop header
LB: loop body
LE: loop exit
PB: predicated region body
PF: predicated region fallthrough
CT: control target
= control target key end

     0   :  { %10 = vsyncpa [#allocation4], 0  ;;  %s404_s0 = inlined_call_operand.vmem [shape: f32[16,32], index: 0, kind: input, shape index: {}]   ;;  %s405_s1 = inlined_call_operand.hbm [shape: f32[32,32], index: 1, kind: input, shape index: {}]   ;;  %s406_s2 = inlined_call_operand.vmem [shape: f32[1,32], index: 2, kind: input, shape index: {}]   ;;  %s407_s3 = inlined_call_operand.vmem [shape: f32[16,8], index: 3, kind: input, shape index: {}]   ;;  %s408_s4 = inlined_call_operand.vmem [shape: f32[8,32], index: 4, kind: input, shape index: {}]   ;;  %s409_s5 = inlined_call_operand.hbm [shape: f32[16,32], index: 5, kind: output, shape index: {}]  }
   0x1   :  { %11 = vsyncpa [#allocation5], 0  ;;  %s332_s18 = smov [#allocation3]  }
   0x2   :  { %s19_s19 = sshll.u32 %s332_s18, 4  ;;  %s20_s19 = int_to_ptr.vmem [resolvable:$true] %s19_s19 }
   0x3   :  { %s296_s20 = scalar_lea.vmem %s20_s19, 512  ;;  %p301_p1 = scmp.lt.s32.totalorder %s20_s19, %s20_s19 }
   0x4   :  { %p297_p0 = scmp.ne.s32.totalorder %s20_s19, %s296_s20  ;;  %p302_p2 = scmp.lt.s32.totalorder %s296_s20, %s296_s20 }
   0x6   :  { %p303_p3 = por %p302_p2, %p301_p1 }
   0x8   :  { %p304_p4 = pnand %p303_p3, %p297_p0 }
   0xa   :  { %307 = shalt.err (!%p304_p4)
}
   0xb   :  { %s333_s21 = smov 128   ;;  %s334_s22 = smov 8  }
   0xc   :  { %25 = dma.hbm_to_vmem [thread:$0]  %s405_s1, 512, %s20_s19, [#allocation4], %s333_s21, %s333_s21, %s334_s22  }
   0xd   :  { %328 = dma.done.wait [#allocation4], 512  }
   0xe   :  { %329 = vsyncadd [#allocation4], 4294966784  ;;  %vm46_vm0 = vcmask 261120   ;;  %v56_v0 = vld [vmem:[#allocation3 + $0x18] sm:$0xff]  ;;  %v55_v1 = vld [vmem:[#allocation3 + $0x10] sm:$0xff]  ;;  %vm149_vm1 = vcmask 64512  }
   0xf   :  { %268 = vmatprep.subr.mxu0 %v56_v0  ;;  %v51_v2 = vld [vmem:[%s404_s0] sm:$0xff]  ;;  %v54_v3 = vld [vmem:[#allocation3 + $0x8] sm:$0xff]  ;;  %v147_v6 = vld [vmem:[%s407_s3 + $0x8] sm:$0xff] }
  0x10   :  { %269 = vmatpush3.msra.mxu0 %v56_v0  ;;  %276 = vmatprep.mubr.msk.f32.mxu0 %vm46_vm0, %v51_v2  ;;  %v148_v4 = vld [vmem:[%s408_s4] sm:$0xff]  ;;  %v53_v8 = vld [vmem:[#allocation3] sm:$0xff]  ;;  %v52_v9 = vld [vmem:[%s404_s0 + $0x8] sm:$0xff] }
  0x11   :  { %v146_v5 = vld [vmem:[%s407_s3] sm:$0xff]  ;;  %270 = vmatprep.subr.mxu0 %v55_v1  ;;  %279 = vmatprep.subr.mxu1 %v148_v4 }
  0x12   :  { %v254_v7 = vld [vmem:[%s406_s2] ss:$0 sm:$0xff]  ;;  %271 = vmatpush3.msra.mxu0 %v55_v1  ;;  %280 = vmatpush3.msra.mxu1 %v148_v4  ;;  %s335_s2 = smov [#allocation6]  }
  0x13   :  { %48 = vst.msk [vmem:[#allocation2 + $0x8] sm:$0xff] %vm46_vm0, %v254_v7  ;;  %47 = vst.msk [vmem:[#allocation2] sm:$0xff] %vm46_vm0, %v254_v7  ;;  %272 = vmatprep.subr.mxu0 %v54_v3  ;;  %281 = vmatprep.mubr.msk.f32.mxu1 %vm149_vm1, %v146_v5  ;;  %s242_s3 = sshll.u32 %s335_s2, 4  ;;  %s243_s3 = int_to_ptr.vmem [resolvable:$true] %s242_s3 }
  0x14   :  { %273 = vmatpush3.msra.mxu0 %v54_v3  ;;  %282 = vmatmul.mubr.msk.f32.vlgmr.msra.gmra.mxu1 %vm149_vm1, %v147_v6  ;;  %s308_s0 = scalar_lea.vmem %s243_s3, 256  ;;  %p313_p6 = scmp.lt.s32.totalorder %s243_s3, %s243_s3 }
  0x15   :  { %274 = vmatprep.subr.mxu0 %v53_v8  ;;  %p309_p5 = scmp.ne.s32.totalorder %s243_s3, %s308_s0  ;;  %p314_p7 = scmp.lt.s32.totalorder %s308_s0, %s308_s0 }
  0x16   :  { %275 = vmatpush3.msra.mxu0 %v53_v8 }
  0x17   :  { %277 = vmatmul.mubr.msk.f32.vlgmr.msra.gmra.mxu0 %vm46_vm0, %v52_v9  ;;  %p315_p8 = por %p314_p7, %p313_p6 }
  0x19   :  { %p316_p9 = pnand %p315_p8, %p309_p5 }
  0x1a   :  { %v50_v10 = vld [vmem:[#allocation2 + $0x8] sm:$0xff]  ;;  %v49_v12 = vld [vmem:[#allocation2] sm:$0xff] }
  0xd4   :  { %v283_v16 = vpop.f32.mrf.mxu1 }
  0xd6   :  { %v222_v19 = vpop.f32.mrf.mxu1 }
  0xd7   :  { %v278_v11 = vpop.f32.mrf.mxu0 }
  0xd8   :  { %v140_v13 = vadd.f32 %v278_v11, %v50_v10 }
  0xd9   :  { %v130_v14 = vpop.f32.mrf.mxu0 }
  0xda   :  { %142 = vst.msk [vmem:[#allocation2 + $0x8] sm:$0xff] %vm46_vm0, %v140_v13  ;;  %v139_v15 = vadd.f32 %v130_v14, %v49_v12 }
  0xdc   :  { %141 = vst.msk [vmem:[#allocation2] sm:$0xff] %vm46_vm0, %v139_v15 }
  0xe1   :  { %v232_v17 = vld [vmem:[#allocation2 + $0x8] sm:$0xff] }
  0xe2   :  { %v234_v18 = vadd.f32 %v283_v16, %v232_v17 }
  0xe3   :  { %v231_v20 = vld [vmem:[#allocation2] sm:$0xff] }
  0xe4   :  { %236 = vst.msk [vmem:[#allocation6 + $0x8] sm:$0xff] %vm46_vm0, %v234_v18  ;;  %v233_v21 = vadd.f32 %v231_v20, %v222_v19 }
  0xe6   :  { %235 = vst.msk [vmem:[#allocation6] sm:$0xff] %vm46_vm0, %v233_v21 }
  0xe7   :  { %319 = shalt.err (!%p316_p9)
}
  0xe8   :  { %248 = dma.vmem_to_hbm [thread:$0]  %s243_s3, 256, %s409_s5, [#allocation5], %s333_s21, %s333_s21, %s334_s22  }
  0xe9   :  { %330 = dma.done.wait [#allocation5], 256  }
  0xea   :  { %331 = vsyncadd [#allocation5], 4294967040 }
  0xeb   :  { %252 = vsyncpa [#allocation4], 1 }
  0xec   :  { %253 = vsyncpa [#allocation5], 1 }

</bundles_post_ra>
